<compile_context>
chip_gen: v7x
topology: tpu7x:2x2x1
jax: 0.10.0
libtpu: 0.0.40
codegen_flags: <defaults>
</compile_context>

<pallas_src>
import functools

import jax
import jax.numpy as jnp
from jax.experimental import pallas as pl
from jax.experimental.pallas import tpu as pltpu


def _attention_kernel(x_ref, wq_ref, wk_ref, wv_ref, wp_ref, b_ref, o_ref,
                      k_scr, v_scr, oh_scr, *, num_heads, head_dim):
    """One (batch, q-tile) grid step.

    x_ref  : (N, C)        full sequence of this batch element (batch dim squeezed)
    wq_ref : (C, C)        q projection, transposed, head-major lanes, scale folded in
    wk_ref : (C, C)        k projection (transposed)
    wv_ref : (C, C)        v projection (transposed)
    wp_ref : (C, C)        output projection (transposed)
    b_ref  : (1, C)        output-projection bias (f32)
    o_ref  : (block_q, C)  output rows of this q tile
    k_scr  : (N, C)        K for this batch element (persists across q tiles)
    v_scr  : (N, C)        V for this batch element (persists across q tiles)
    oh_scr : (block_q, C)  assembled per-head attention outputs (head-major lanes)
    """
    f32 = jnp.float32
    qi = pl.program_id(1)
    block_q = o_ref.shape[0]
    dt = k_scr.dtype

    # --- K / V projection: full-C contraction, once per batch element. ---------
    # The q-tile axis is innermost and "arbitrary", so this scratch stays valid
    # for every q tile of the current batch element.
    @pl.when(qi == 0)
    def _():
        xkv = x_ref[...]
        k_scr[...] = jnp.dot(xkv, wk_ref[...], preferred_element_type=f32).astype(dt)
        v_scr[...] = jnp.dot(xkv, wv_ref[...], preferred_element_type=f32).astype(dt)

    # --- Q projection for this tile (scale already folded into Wq). ------------
    q_start = pl.multiple_of(qi * block_q, block_q)
    xq = x_ref[pl.ds(q_start, block_q), :]
    q = jnp.dot(xq, wq_ref[...], preferred_element_type=f32).astype(dt)   # (bq, C)
    k = k_scr[...]                                                        # (N, C)
    v = v_scr[...]                                                        # (N, C)

    # --- Per-head attention; heads are static lane slices of width hd. ---------
    for h in range(num_heads):
        lo, hi = h * head_dim, (h + 1) * head_dim
        q_h = q[:, lo:hi]                                                 # (bq, hd)
        k_h = k[:, lo:hi]                                                 # (kv, hd)
        v_h = v[:, lo:hi]                                                 # (kv, hd)

        # Scores + softmax statistics in f32.
        s = jax.lax.dot_general(q_h, k_h, (((1,), (1,)), ((), ())),
                                preferred_element_type=f32)               # (bq, kv)
        s = s - jnp.max(s, axis=-1, keepdims=True)
        p = jnp.exp(s)
        denom = jnp.sum(p, axis=-1, keepdims=True)                        # (bq, 1)

        # Deferred normalization: scale the (bq, hd) output, not the (bq, kv)
        # probability tensor; reciprocal rides the EUP slot.
        o_h = jnp.dot(p.astype(dt), v_h, preferred_element_type=f32)      # (bq, hd)
        o_h = o_h * pl.reciprocal(denom, approx=True)
        oh_scr[:, lo:hi] = o_h.astype(dt)

    # --- Single full-C output projection + bias. --------------------------------
    y = jnp.dot(oh_scr[...], wp_ref[...], preferred_element_type=f32)     # (bq, C)
    o_ref[...] = (y + b_ref[...]).astype(o_ref.dtype)


def attention_pallas(x, w_qkv, w_proj, b_proj, *, num_heads,
                     block_q=None, compute_dtype=None):
    """x: (B, N, C).  Weights in PyTorch nn.Linear layout:
       w_qkv: (3C, C) (qkv has no bias), w_proj: (C, C), b_proj: (C,).

    compute_dtype: optional dtype for MXU operands (e.g. jnp.bfloat16); the
    output stays in x.dtype and accumulation / softmax stats stay in f32.
    """
    B, N, C = x.shape
    H = num_heads
    hd = C // H
    scale = float(hd) ** -0.5
    if block_q is None:
        block_q = N
    assert N % block_q == 0, "block_q must divide N"
    dt = x.dtype if compute_dtype is None else compute_dtype

    # One-time repack (parameter-load time in a real model).  PyTorch Linear is
    # (out_features, in_features); transpose so the kernel contracts x @ W.  The
    # qkv output features are already ordered (t, h, d), so rows [tC:(t+1)C] of
    # w_qkv give a head-major (h*hd + d) lane layout; fold the 1/sqrt(hd) scale
    # into Wq.  w_proj's input features use the same head-major order, matching
    # the assembled head-output buffer.
    wq = (w_qkv[0 * C:1 * C].T * scale).astype(dt)
    wk = w_qkv[1 * C:2 * C].T.astype(dt)
    wv = w_qkv[2 * C:3 * C].T.astype(dt)
    wp = w_proj.T.astype(dt)
    bp = jnp.reshape(b_proj, (1, C)).astype(jnp.float32)
    xc = x.astype(dt)

    grid = (B, N // block_q)     # batch "parallel" (megacore), q tiles "arbitrary"

    # VMEM budget estimate (double-buffered blocks + scratch) -> scoped limit.
    isz = jnp.dtype(dt).itemsize
    est = isz * (2 * N * C            # x block (per batch element)
                 + 2 * block_q * C    # output block, double-buffered
                 + 2 * 4 * C * C      # 4 weight matrices, double-buffered
                 + 2 * N * C          # K / V scratch
                 + block_q * C)       # head-output scratch
    vmem_limit = int(min(max(2 * est, 32 * 1024 * 1024), 64 * 1024 * 1024))

    kernel = functools.partial(_attention_kernel, num_heads=H, head_dim=hd)

    return pl.pallas_call(
        kernel,
        out_shape=jax.ShapeDtypeStruct((B, N, C), x.dtype),
        grid=grid,
        in_specs=[
            pl.BlockSpec((None, N, C), lambda bi, qi: (bi, 0, 0)),   # x (one read)
            pl.BlockSpec((C, C), lambda bi, qi: (0, 0)),             # Wq (scaled)
            pl.BlockSpec((C, C), lambda bi, qi: (0, 0)),             # Wk
            pl.BlockSpec((C, C), lambda bi, qi: (0, 0)),             # Wv
            pl.BlockSpec((C, C), lambda bi, qi: (0, 0)),             # Wproj
            pl.BlockSpec((1, C), lambda bi, qi: (0, 0)),             # bias
        ],
        out_specs=pl.BlockSpec((None, block_q, C), lambda bi, qi: (bi, qi, 0)),
        scratch_shapes=[
            pltpu.VMEM((N, C), dt),         # K (per batch element)
            pltpu.VMEM((N, C), dt),         # V (per batch element)
            pltpu.VMEM((block_q, C), dt),   # assembled head outputs
        ],
        compiler_params=pltpu.CompilerParams(
            dimension_semantics=("parallel", "arbitrary"),
            vmem_limit_bytes=vmem_limit),
    )(xc, wq, wk, wv, wp, bp)


def attention_ref(x, w_qkv, w_proj, b_proj, *, num_heads):
    """Pure-JAX reference mirroring the PyTorch forward (dropout = identity)."""
    B, N, C = x.shape
    H = num_heads
    hd = C // H
    scale = float(hd) ** -0.5
    qkv = jnp.einsum('bnc,oc->bno', x, w_qkv)                         # x @ Wqkv^T
    qkv = qkv.reshape(B, N, 3, H, hd).transpose(2, 0, 3, 1, 4)
    q, k, v = qkv[0], qkv[1], qkv[2]                                  # (B, H, N, hd)
    attn = jnp.einsum('bhnd,bhmd->bhnm', q, k) * scale
    attn = jax.nn.softmax(attn, axis=-1)
    out = jnp.einsum('bhnm,bhmd->bhnd', attn, v)
    out = out.transpose(0, 2, 1, 3).reshape(B, N, C)
    return jnp.einsum('bnc,oc->bno', out, w_proj) + b_proj


if __name__ == "__main__":
    def check(B, N, C, H, *, block_q=None, compute_dtype=None, atol=5e-3, rtol=5e-3):
        key = jax.random.PRNGKey(0)
        kx, kq, kp, kb = jax.random.split(key, 4)
        x = jax.random.normal(kx, (B, N, C), dtype=jnp.float32)
        # PyTorch nn.Linear layout: (out_features, in_features); synthetic init.
        w_qkv = jax.random.normal(kq, (3 * C, C), dtype=jnp.float32) / jnp.sqrt(C)
        w_proj = jax.random.normal(kp, (C, C), dtype=jnp.float32) / jnp.sqrt(C)
        b_proj = 0.1 * jax.random.normal(kb, (C,), dtype=jnp.float32)

        out = attention_pallas(x, w_qkv, w_proj, b_proj, num_heads=H,
                               block_q=block_q, compute_dtype=compute_dtype)
        out = jax.block_until_ready(out)
        ref = attention_ref(x, w_qkv, w_proj, b_proj, num_heads=H)

        assert out.shape == (B, N, C)
        err = float(jnp.max(jnp.abs(out - ref)))
        assert jnp.allclose(out, ref, atol=atol, rtol=rtol), (
            f"mismatch vs reference at {(B, N, C, H, block_q, compute_dtype)}: "
            f"max abs err {err}")

    # Tiny benchmark shape (matches the module defaults at small dims).
    check(2, 8, 32, 8)
    # Lane-dense channel width closer to a real CCT embedding dim.
    check(2, 8, 128, 8)
    # q-tiled path: exercises the K/V hoist (pl.when) + scratch persistence.
    check(2, 16, 128, 8, block_q=8)
    # bf16 MXU operands with f32 accumulation (looser tolerance vs f32 reference).
    check(2, 8, 128, 8, compute_dtype=jnp.bfloat16, atol=8e-2, rtol=8e-2)

    print("KERNEL_OK")
</pallas_src>

<mosaic_0001>
module attributes {stable_mosaic.version = 11 : i64} {
  func.func @_attention_kernel(%arg0: i32, %arg1: i32, %arg2: memref<1x8x32xf32, #tpu.memory_space<vmem>>, %arg3: memref<32x32xf32, #tpu.memory_space<vmem>>, %arg4: memref<32x32xf32, #tpu.memory_space<vmem>>, %arg5: memref<32x32xf32, #tpu.memory_space<vmem>>, %arg6: memref<32x32xf32, #tpu.memory_space<vmem>>, %arg7: memref<1x32xf32, #tpu.memory_space<vmem>>, %arg8: memref<1x8x32xf32, #tpu.memory_space<vmem>>, %arg9: memref<8x32xf32, #tpu.memory_space<vmem>>, %arg10: memref<8x32xf32, #tpu.memory_space<vmem>>, %arg11: memref<8x32xf32, #tpu.memory_space<vmem>>) attributes {dimension_semantics = [#tpu.dimension_semantics<parallel>, #tpu.dimension_semantics<arbitrary>], iteration_bounds = array<i64: 2, 1>, scalar_prefetch = 0 : i64, scratch_operands = 3 : i64, tpu.core_type = #tpu.core_type<tc>, window_params = [{transform_indices = @transform_0, window_bounds = array<i64: 1, 8, 32>}, {pipeline_mode = #tpu.pipeline_mode<synchronous>, transform_indices = @transform_1, window_bounds = array<i64: 32, 32>}, {pipeline_mode = #tpu.pipeline_mode<synchronous>, transform_indices = @transform_2, window_bounds = array<i64: 32, 32>}, {pipeline_mode = #tpu.pipeline_mode<synchronous>, transform_indices = @transform_3, window_bounds = array<i64: 32, 32>}, {pipeline_mode = #tpu.pipeline_mode<synchronous>, transform_indices = @transform_4, window_bounds = array<i64: 32, 32>}, {pipeline_mode = #tpu.pipeline_mode<synchronous>, transform_indices = @transform_5, window_bounds = array<i64: 1, 32>}, {transform_indices = @transform_6, window_bounds = array<i64: 1, 8, 32>}]} {
    %c0_i32 = arith.constant 0 : i32
    %0 = arith.cmpi eq, %arg1, %c0_i32 : i32
    %1 = arith.extui %0 : i1 to i32
    %c0_i32_0 = arith.constant 0 : i32
    %2 = arith.cmpi ne, %1, %c0_i32_0 : i32
    scf.if %2 {
      %c0_59 = arith.constant 0 : index
      %c0_60 = arith.constant 0 : index
      %c0_61 = arith.constant 0 : index
      %149 = vector.load %arg2[%c0_59, %c0_60, %c0_61] : memref<1x8x32xf32, #tpu.memory_space<vmem>>, vector<1x8x32xf32>
      %150 = vector.shape_cast %149 : vector<1x8x32xf32> to vector<8x32xf32>
      %c0_62 = arith.constant 0 : index
      %c0_63 = arith.constant 0 : index
      %151 = vector.load %arg4[%c0_62, %c0_63] : memref<32x32xf32, #tpu.memory_space<vmem>>, vector<32x32xf32>
      %cst_64 = arith.constant dense<0.000000e+00> : vector<8x32xf32>
      %152 = tpu.matmul %150, %151, %cst_64 {dimension_numbers = #tpu.dot_dimension_numbers<[1], [0], [0], [1], [0, 0, 1, 1], [], []>} : vector<8x32xf32>, vector<32x32xf32>, vector<8x32xf32> -> vector<8x32xf32>
      %c0_65 = arith.constant 0 : index
      %c0_66 = arith.constant 0 : index
      %153 = vector.load %arg9[%c0_65, %c0_66] : memref<8x32xf32, #tpu.memory_space<vmem>>, vector<8x32xf32>
      tpu.vector_store %arg9[%c0_65, %c0_66], %152 {strides = array<i32>} : memref<8x32xf32, #tpu.memory_space<vmem>>, vector<8x32xf32>,
      %c0_67 = arith.constant 0 : index
      %c0_68 = arith.constant 0 : index
      %154 = vector.load %arg5[%c0_67, %c0_68] : memref<32x32xf32, #tpu.memory_space<vmem>>, vector<32x32xf32>
      %cst_69 = arith.constant dense<0.000000e+00> : vector<8x32xf32>
      %155 = tpu.matmul %150, %154, %cst_69 {dimension_numbers = #tpu.dot_dimension_numbers<[1], [0], [0], [1], [0, 0, 1, 1], [], []>} : vector<8x32xf32>, vector<32x32xf32>, vector<8x32xf32> -> vector<8x32xf32>
      %c0_70 = arith.constant 0 : index
      %c0_71 = arith.constant 0 : index
      %156 = vector.load %arg10[%c0_70, %c0_71] : memref<8x32xf32, #tpu.memory_space<vmem>>, vector<8x32xf32>
      tpu.vector_store %arg10[%c0_70, %c0_71], %155 {strides = array<i32>} : memref<8x32xf32, #tpu.memory_space<vmem>>, vector<8x32xf32>,
    } else {
    }
    %c8_i32 = arith.constant 8 : i32
    %3 = arith.muli %arg1, %c8_i32 : i32
    %4 = tpu.assume_multiple %3, 8 : i32
    %c0 = arith.constant 0 : index
    %5 = arith.index_cast %4 : i32 to index
    %c0_1 = arith.constant 0 : index
    %6 = vector.load %arg2[%c0, %5, %c0_1] : memref<1x8x32xf32, #tpu.memory_space<vmem>>, vector<1x8x32xf32>
    %7 = vector.shape_cast %6 : vector<1x8x32xf32> to vector<8x32xf32>
    %c0_2 = arith.constant 0 : index
    %c0_3 = arith.constant 0 : index
    %8 = vector.load %arg3[%c0_2, %c0_3] : memref<32x32xf32, #tpu.memory_space<vmem>>, vector<32x32xf32>
    %cst = arith.constant dense<0.000000e+00> : vector<8x32xf32>
    %9 = tpu.matmul %7, %8, %cst {dimension_numbers = #tpu.dot_dimension_numbers<[1], [0], [0], [1], [0, 0, 1, 1], [], []>} : vector<8x32xf32>, vector<32x32xf32>, vector<8x32xf32> -> vector<8x32xf32>
    %c0_4 = arith.constant 0 : index
    %c0_5 = arith.constant 0 : index
    %10 = vector.load %arg9[%c0_4, %c0_5] : memref<8x32xf32, #tpu.memory_space<vmem>>, vector<8x32xf32>
    %c0_6 = arith.constant 0 : index
    %c0_7 = arith.constant 0 : index
    %11 = vector.load %arg10[%c0_6, %c0_7] : memref<8x32xf32, #tpu.memory_space<vmem>>, vector<8x32xf32>
    %12 = vector.extract_strided_slice %9 {offsets = [0, 0], sizes = [8, 4], strides = [1, 1]} : vector<8x32xf32> to vector<8x4xf32>
    %13 = vector.extract_strided_slice %10 {offsets = [0, 0], sizes = [8, 4], strides = [1, 1]} : vector<8x32xf32> to vector<8x4xf32>
    %14 = vector.extract_strided_slice %11 {offsets = [0, 0], sizes = [8, 4], strides = [1, 1]} : vector<8x32xf32> to vector<8x4xf32>
    %cst_8 = arith.constant dense<0.000000e+00> : vector<8x8xf32>
    %15 = tpu.matmul %12, %13, %cst_8 {dimension_numbers = #tpu.dot_dimension_numbers<[1], [1], [0], [0], [0, 0, 1, 0], [], []>} : vector<8x4xf32>, vector<8x4xf32>, vector<8x8xf32> -> vector<8x8xf32>
    %cst_9 = arith.constant dense<0xFF800000> : vector<8xf32>
    %16 = vector.multi_reduction <maximumf>, %15, %cst_9 [1] : vector<8x8xf32> to vector<8xf32>
    %17 = vector.shape_cast %16 : vector<8xf32> to vector<8x1xf32>
    %18 = vector.broadcast %17 : vector<8x1xf32> to vector<8x8xf32>
    %19 = arith.subf %15, %18 : vector<8x8xf32>
    %20 = math.exp %19 : vector<8x8xf32>
    %cst_10 = arith.constant dense<0.000000e+00> : vector<8xf32>
    %21 = vector.multi_reduction <add>, %20, %cst_10 [1] : vector<8x8xf32> to vector<8xf32>
    %22 = vector.shape_cast %21 : vector<8xf32> to vector<8x1xf32>
    %cst_11 = arith.constant dense<0.000000e+00> : vector<8x4xf32>
    %23 = tpu.matmul %20, %14, %cst_11 {dimension_numbers = #tpu.dot_dimension_numbers<[1], [0], [0], [1], [0, 0, 1, 1], [], []>} : vector<8x8xf32>, vector<8x4xf32>, vector<8x4xf32> -> vector<8x4xf32>
    %24 = tpu.reciprocal %22 {approx = true} : vector<8x1xf32> -> vector<8x1xf32>
    %25 = vector.broadcast %24 : vector<8x1xf32> to vector<8x4xf32>
    %26 = arith.mulf %23, %25 : vector<8x4xf32>
    %c0_12 = arith.constant 0 : index
    %c0_13 = arith.constant 0 : index
    %27 = vector.load %arg11[%c0_12, %c0_13] : memref<8x32xf32, #tpu.memory_space<vmem>>, vector<8x4xf32>
    tpu.vector_store %arg11[%c0_12, %c0_13], %26 {strides = array<i32>} : memref<8x32xf32, #tpu.memory_space<vmem>>, vector<8x4xf32>,
    %28 = vector.extract_strided_slice %9 {offsets = [0, 4], sizes = [8, 4], strides = [1, 1]} : vector<8x32xf32> to vector<8x4xf32>
    %29 = vector.extract_strided_slice %10 {offsets = [0, 4], sizes = [8, 4], strides = [1, 1]} : vector<8x32xf32> to vector<8x4xf32>
    %30 = vector.extract_strided_slice %11 {offsets = [0, 4], sizes = [8, 4], strides = [1, 1]} : vector<8x32xf32> to vector<8x4xf32>
    %cst_14 = arith.constant dense<0.000000e+00> : vector<8x8xf32>
    %31 = tpu.matmul %28, %29, %cst_14 {dimension_numbers = #tpu.dot_dimension_numbers<[1], [1], [0], [0], [0, 0, 1, 0], [], []>} : vector<8x4xf32>, vector<8x4xf32>, vector<8x8xf32> -> vector<8x8xf32>
    %cst_15 = arith.constant dense<0xFF800000> : vector<8xf32>
    %32 = vector.multi_reduction <maximumf>, %31, %cst_15 [1] : vector<8x8xf32> to vector<8xf32>
    %33 = vector.shape_cast %32 : vector<8xf32> to vector<8x1xf32>
    %34 = vector.broadcast %33 : vector<8x1xf32> to vector<8x8xf32>
    %35 = arith.subf %31, %34 : vector<8x8xf32>
    %36 = math.exp %35 : vector<8x8xf32>
    %cst_16 = arith.constant dense<0.000000e+00> : vector<8xf32>
    %37 = vector.multi_reduction <add>, %36, %cst_16 [1] : vector<8x8xf32> to vector<8xf32>
    %38 = vector.shape_cast %37 : vector<8xf32> to vector<8x1xf32>
    %cst_17 = arith.constant dense<0.000000e+00> : vector<8x4xf32>
    %39 = tpu.matmul %36, %30, %cst_17 {dimension_numbers = #tpu.dot_dimension_numbers<[1], [0], [0], [1], [0, 0, 1, 1], [], []>} : vector<8x8xf32>, vector<8x4xf32>, vector<8x4xf32> -> vector<8x4xf32>
    %40 = tpu.reciprocal %38 {approx = true} : vector<8x1xf32> -> vector<8x1xf32>
    %41 = vector.broadcast %40 : vector<8x1xf32> to vector<8x4xf32>
    %42 = arith.mulf %39, %41 : vector<8x4xf32>
    %c0_18 = arith.constant 0 : index
    %c4 = arith.constant 4 : index
    %43 = vector.load %arg11[%c0_18, %c4] : memref<8x32xf32, #tpu.memory_space<vmem>>, vector<8x4xf32>
    tpu.vector_store %arg11[%c0_18, %c4], %42 {strides = array<i32>} : memref<8x32xf32, #tpu.memory_space<vmem>>, vector<8x4xf32>,
    %44 = vector.extract_strided_slice %9 {offsets = [0, 8], sizes = [8, 4], strides = [1, 1]} : vector<8x32xf32> to vector<8x4xf32>
    %45 = vector.extract_strided_slice %10 {offsets = [0, 8], sizes = [8, 4], strides = [1, 1]} : vector<8x32xf32> to vector<8x4xf32>
    %46 = vector.extract_strided_slice %11 {offsets = [0, 8], sizes = [8, 4], strides = [1, 1]} : vector<8x32xf32> to vector<8x4xf32>
    %cst_19 = arith.constant dense<0.000000e+00> : vector<8x8xf32>
    %47 = tpu.matmul %44, %45, %cst_19 {dimension_numbers = #tpu.dot_dimension_numbers<[1], [1], [0], [0], [0, 0, 1, 0], [], []>} : vector<8x4xf32>, vector<8x4xf32>, vector<8x8xf32> -> vector<8x8xf32>
    %cst_20 = arith.constant dense<0xFF800000> : vector<8xf32>
    %48 = vector.multi_reduction <maximumf>, %47, %cst_20 [1] : vector<8x8xf32> to vector<8xf32>
    %49 = vector.shape_cast %48 : vector<8xf32> to vector<8x1xf32>
    %50 = vector.broadcast %49 : vector<8x1xf32> to vector<8x8xf32>
    %51 = arith.subf %47, %50 : vector<8x8xf32>
    %52 = math.exp %51 : vector<8x8xf32>
    %cst_21 = arith.constant dense<0.000000e+00> : vector<8xf32>
    %53 = vector.multi_reduction <add>, %52, %cst_21 [1] : vector<8x8xf32> to vector<8xf32>
    %54 = vector.shape_cast %53 : vector<8xf32> to vector<8x1xf32>
    %cst_22 = arith.constant dense<0.000000e+00> : vector<8x4xf32>
    %55 = tpu.matmul %52, %46, %cst_22 {dimension_numbers = #tpu.dot_dimension_numbers<[1], [0], [0], [1], [0, 0, 1, 1], [], []>} : vector<8x8xf32>, vector<8x4xf32>, vector<8x4xf32> -> vector<8x4xf32>
    %56 = tpu.reciprocal %54 {approx = true} : vector<8x1xf32> -> vector<8x1xf32>
    %57 = vector.broadcast %56 : vector<8x1xf32> to vector<8x4xf32>
    %58 = arith.mulf %55, %57 : vector<8x4xf32>
    %c0_23 = arith.constant 0 : index
    %c8 = arith.constant 8 : index
    %59 = vector.load %arg11[%c0_23, %c8] : memref<8x32xf32, #tpu.memory_space<vmem>>, vector<8x4xf32>
    tpu.vector_store %arg11[%c0_23, %c8], %58 {strides = array<i32>} : memref<8x32xf32, #tpu.memory_space<vmem>>, vector<8x4xf32>,
    %60 = vector.extract_strided_slice %9 {offsets = [0, 12], sizes = [8, 4], strides = [1, 1]} : vector<8x32xf32> to vector<8x4xf32>
    %61 = vector.extract_strided_slice %10 {offsets = [0, 12], sizes = [8, 4], strides = [1, 1]} : vector<8x32xf32> to vector<8x4xf32>
    %62 = vector.extract_strided_slice %11 {offsets = [0, 12], sizes = [8, 4], strides = [1, 1]} : vector<8x32xf32> to vector<8x4xf32>
    %cst_24 = arith.constant dense<0.000000e+00> : vector<8x8xf32>
    %63 = tpu.matmul %60, %61, %cst_24 {dimension_numbers = #tpu.dot_dimension_numbers<[1], [1], [0], [0], [0, 0, 1, 0], [], []>} : vector<8x4xf32>, vector<8x4xf32>, vector<8x8xf32> -> vector<8x8xf32>
    %cst_25 = arith.constant dense<0xFF800000> : vector<8xf32>
    %64 = vector.multi_reduction <maximumf>, %63, %cst_25 [1] : vector<8x8xf32> to vector<8xf32>
    %65 = vector.shape_cast %64 : vector<8xf32> to vector<8x1xf32>
    %66 = vector.broadcast %65 : vector<8x1xf32> to vector<8x8xf32>
    %67 = arith.subf %63, %66 : vector<8x8xf32>
    %68 = math.exp %67 : vector<8x8xf32>
    %cst_26 = arith.constant dense<0.000000e+00> : vector<8xf32>
    %69 = vector.multi_reduction <add>, %68, %cst_26 [1] : vector<8x8xf32> to vector<8xf32>
    %70 = vector.shape_cast %69 : vector<8xf32> to vector<8x1xf32>
    %cst_27 = arith.constant dense<0.000000e+00> : vector<8x4xf32>
    %71 = tpu.matmul %68, %62, %cst_27 {dimension_numbers = #tpu.dot_dimension_numbers<[1], [0], [0], [1], [0, 0, 1, 1], [], []>} : vector<8x8xf32>, vector<8x4xf32>, vector<8x4xf32> -> vector<8x4xf32>
    %72 = tpu.reciprocal %70 {approx = true} : vector<8x1xf32> -> vector<8x1xf32>
    %73 = vector.broadcast %72 : vector<8x1xf32> to vector<8x4xf32>
    %74 = arith.mulf %71, %73 : vector<8x4xf32>
    %c0_28 = arith.constant 0 : index
    %c12 = arith.constant 12 : index
    %75 = vector.load %arg11[%c0_28, %c12] : memref<8x32xf32, #tpu.memory_space<vmem>>, vector<8x4xf32>
    tpu.vector_store %arg11[%c0_28, %c12], %74 {strides = array<i32>} : memref<8x32xf32, #tpu.memory_space<vmem>>, vector<8x4xf32>,
    %76 = vector.extract_strided_slice %9 {offsets = [0, 16], sizes = [8, 4], strides = [1, 1]} : vector<8x32xf32> to vector<8x4xf32>
    %77 = vector.extract_strided_slice %10 {offsets = [0, 16], sizes = [8, 4], strides = [1, 1]} : vector<8x32xf32> to vector<8x4xf32>
    %78 = vector.extract_strided_slice %11 {offsets = [0, 16], sizes = [8, 4], strides = [1, 1]} : vector<8x32xf32> to vector<8x4xf32>
    %cst_29 = arith.constant dense<0.000000e+00> : vector<8x8xf32>
    %79 = tpu.matmul %76, %77, %cst_29 {dimension_numbers = #tpu.dot_dimension_numbers<[1], [1], [0], [0], [0, 0, 1, 0], [], []>} : vector<8x4xf32>, vector<8x4xf32>, vector<8x8xf32> -> vector<8x8xf32>
    %cst_30 = arith.constant dense<0xFF800000> : vector<8xf32>
    %80 = vector.multi_reduction <maximumf>, %79, %cst_30 [1] : vector<8x8xf32> to vector<8xf32>
    %81 = vector.shape_cast %80 : vector<8xf32> to vector<8x1xf32>
    %82 = vector.broadcast %81 : vector<8x1xf32> to vector<8x8xf32>
    %83 = arith.subf %79, %82 : vector<8x8xf32>
    %84 = math.exp %83 : vector<8x8xf32>
    %cst_31 = arith.constant dense<0.000000e+00> : vector<8xf32>
    %85 = vector.multi_reduction <add>, %84, %cst_31 [1] : vector<8x8xf32> to vector<8xf32>
    %86 = vector.shape_cast %85 : vector<8xf32> to vector<8x1xf32>
    %cst_32 = arith.constant dense<0.000000e+00> : vector<8x4xf32>
    %87 = tpu.matmul %84, %78, %cst_32 {dimension_numbers = #tpu.dot_dimension_numbers<[1], [0], [0], [1], [0, 0, 1, 1], [], []>} : vector<8x8xf32>, vector<8x4xf32>, vector<8x4xf32> -> vector<8x4xf32>
    %88 = tpu.reciprocal %86 {approx = true} : vector<8x1xf32> -> vector<8x1xf32>
    %89 = vector.broadcast %88 : vector<8x1xf32> to vector<8x4xf32>
    %90 = arith.mulf %87, %89 : vector<8x4xf32>
    %c0_33 = arith.constant 0 : index
    %c16 = arith.constant 16 : index
    %91 = vector.load %arg11[%c0_33, %c16] : memref<8x32xf32, #tpu.memory_space<vmem>>, vector<8x4xf32>
    tpu.vector_store %arg11[%c0_33, %c16], %90 {strides = array<i32>} : memref<8x32xf32, #tpu.memory_space<vmem>>, vector<8x4xf32>,
    %92 = vector.extract_strided_slice %9 {offsets = [0, 20], sizes = [8, 4], strides = [1, 1]} : vector<8x32xf32> to vector<8x4xf32>
    %93 = vector.extract_strided_slice %10 {offsets = [0, 20], sizes = [8, 4], strides = [1, 1]} : vector<8x32xf32> to vector<8x4xf32>
    %94 = vector.extract_strided_slice %11 {offsets = [0, 20], sizes = [8, 4], strides = [1, 1]} : vector<8x32xf32> to vector<8x4xf32>
    %cst_34 = arith.constant dense<0.000000e+00> : vector<8x8xf32>
    %95 = tpu.matmul %92, %93, %cst_34 {dimension_numbers = #tpu.dot_dimension_numbers<[1], [1], [0], [0], [0, 0, 1, 0], [], []>} : vector<8x4xf32>, vector<8x4xf32>, vector<8x8xf32> -> vector<8x8xf32>
    %cst_35 = arith.constant dense<0xFF800000> : vector<8xf32>
    %96 = vector.multi_reduction <maximumf>, %95, %cst_35 [1] : vector<8x8xf32> to vector<8xf32>
    %97 = vector.shape_cast %96 : vector<8xf32> to vector<8x1xf32>
    %98 = vector.broadcast %97 : vector<8x1xf32> to vector<8x8xf32>
    %99 = arith.subf %95, %98 : vector<8x8xf32>
    %100 = math.exp %99 : vector<8x8xf32>
    %cst_36 = arith.constant dense<0.000000e+00> : vector<8xf32>
    %101 = vector.multi_reduction <add>, %100, %cst_36 [1] : vector<8x8xf32> to vector<8xf32>
    %102 = vector.shape_cast %101 : vector<8xf32> to vector<8x1xf32>
    %cst_37 = arith.constant dense<0.000000e+00> : vector<8x4xf32>
    %103 = tpu.matmul %100, %94, %cst_37 {dimension_numbers = #tpu.dot_dimension_numbers<[1], [0], [0], [1], [0, 0, 1, 1], [], []>} : vector<8x8xf32>, vector<8x4xf32>, vector<8x4xf32> -> vector<8x4xf32>
    %104 = tpu.reciprocal %102 {approx = true} : vector<8x1xf32> -> vector<8x1xf32>
    %105 = vector.broadcast %104 : vector<8x1xf32> to vector<8x4xf32>
    %106 = arith.mulf %103, %105 : vector<8x4xf32>
    %c0_38 = arith.constant 0 : index
    %c20 = arith.constant 20 : index
    %107 = vector.load %arg11[%c0_38, %c20] : memref<8x32xf32, #tpu.memory_space<vmem>>, vector<8x4xf32>
    tpu.vector_store %arg11[%c0_38, %c20], %106 {strides = array<i32>} : memref<8x32xf32, #tpu.memory_space<vmem>>, vector<8x4xf32>,
    %108 = vector.extract_strided_slice %9 {offsets = [0, 24], sizes = [8, 4], strides = [1, 1]} : vector<8x32xf32> to vector<8x4xf32>
    %109 = vector.extract_strided_slice %10 {offsets = [0, 24], sizes = [8, 4], strides = [1, 1]} : vector<8x32xf32> to vector<8x4xf32>
    %110 = vector.extract_strided_slice %11 {offsets = [0, 24], sizes = [8, 4], strides = [1, 1]} : vector<8x32xf32> to vector<8x4xf32>
    %cst_39 = arith.constant dense<0.000000e+00> : vector<8x8xf32>
    %111 = tpu.matmul %108, %109, %cst_39 {dimension_numbers = #tpu.dot_dimension_numbers<[1], [1], [0], [0], [0, 0, 1, 0], [], []>} : vector<8x4xf32>, vector<8x4xf32>, vector<8x8xf32> -> vector<8x8xf32>
    %cst_40 = arith.constant dense<0xFF800000> : vector<8xf32>
    %112 = vector.multi_reduction <maximumf>, %111, %cst_40 [1] : vector<8x8xf32> to vector<8xf32>
    %113 = vector.shape_cast %112 : vector<8xf32> to vector<8x1xf32>
    %114 = vector.broadcast %113 : vector<8x1xf32> to vector<8x8xf32>
    %115 = arith.subf %111, %114 : vector<8x8xf32>
    %116 = math.exp %115 : vector<8x8xf32>
    %cst_41 = arith.constant dense<0.000000e+00> : vector<8xf32>
    %117 = vector.multi_reduction <add>, %116, %cst_41 [1] : vector<8x8xf32> to vector<8xf32>
    %118 = vector.shape_cast %117 : vector<8xf32> to vector<8x1xf32>
    %cst_42 = arith.constant dense<0.000000e+00> : vector<8x4xf32>
    %119 = tpu.matmul %116, %110, %cst_42 {dimension_numbers = #tpu.dot_dimension_numbers<[1], [0], [0], [1], [0, 0, 1, 1], [], []>} : vector<8x8xf32>, vector<8x4xf32>, vector<8x4xf32> -> vector<8x4xf32>
    %120 = tpu.reciprocal %118 {approx = true} : vector<8x1xf32> -> vector<8x1xf32>
    %121 = vector.broadcast %120 : vector<8x1xf32> to vector<8x4xf32>
    %122 = arith.mulf %119, %121 : vector<8x4xf32>
    %c0_43 = arith.constant 0 : index
    %c24 = arith.constant 24 : index
    %123 = vector.load %arg11[%c0_43, %c24] : memref<8x32xf32, #tpu.memory_space<vmem>>, vector<8x4xf32>
    tpu.vector_store %arg11[%c0_43, %c24], %122 {strides = array<i32>} : memref<8x32xf32, #tpu.memory_space<vmem>>, vector<8x4xf32>,
    %124 = vector.extract_strided_slice %9 {offsets = [0, 28], sizes = [8, 4], strides = [1, 1]} : vector<8x32xf32> to vector<8x4xf32>
    %125 = vector.extract_strided_slice %10 {offsets = [0, 28], sizes = [8, 4], strides = [1, 1]} : vector<8x32xf32> to vector<8x4xf32>
    %126 = vector.extract_strided_slice %11 {offsets = [0, 28], sizes = [8, 4], strides = [1, 1]} : vector<8x32xf32> to vector<8x4xf32>
    %cst_44 = arith.constant dense<0.000000e+00> : vector<8x8xf32>
    %127 = tpu.matmul %124, %125, %cst_44 {dimension_numbers = #tpu.dot_dimension_numbers<[1], [1], [0], [0], [0, 0, 1, 0], [], []>} : vector<8x4xf32>, vector<8x4xf32>, vector<8x8xf32> -> vector<8x8xf32>
    %cst_45 = arith.constant dense<0xFF800000> : vector<8xf32>
    %128 = vector.multi_reduction <maximumf>, %127, %cst_45 [1] : vector<8x8xf32> to vector<8xf32>
    %129 = vector.shape_cast %128 : vector<8xf32> to vector<8x1xf32>
    %130 = vector.broadcast %129 : vector<8x1xf32> to vector<8x8xf32>
    %131 = arith.subf %127, %130 : vector<8x8xf32>
    %132 = math.exp %131 : vector<8x8xf32>
    %cst_46 = arith.constant dense<0.000000e+00> : vector<8xf32>
    %133 = vector.multi_reduction <add>, %132, %cst_46 [1] : vector<8x8xf32> to vector<8xf32>
    %134 = vector.shape_cast %133 : vector<8xf32> to vector<8x1xf32>
    %cst_47 = arith.constant dense<0.000000e+00> : vector<8x4xf32>
    %135 = tpu.matmul %132, %126, %cst_47 {dimension_numbers = #tpu.dot_dimension_numbers<[1], [0], [0], [1], [0, 0, 1, 1], [], []>} : vector<8x8xf32>, vector<8x4xf32>, vector<8x4xf32> -> vector<8x4xf32>
    %136 = tpu.reciprocal %134 {approx = true} : vector<8x1xf32> -> vector<8x1xf32>
    %137 = vector.broadcast %136 : vector<8x1xf32> to vector<8x4xf32>
    %138 = arith.mulf %135, %137 : vector<8x4xf32>
    %c0_48 = arith.constant 0 : index
    %c28 = arith.constant 28 : index
    %139 = vector.load %arg11[%c0_48, %c28] : memref<8x32xf32, #tpu.memory_space<vmem>>, vector<8x4xf32>
    tpu.vector_store %arg11[%c0_48, %c28], %138 {strides = array<i32>} : memref<8x32xf32, #tpu.memory_space<vmem>>, vector<8x4xf32>,
    %c0_49 = arith.constant 0 : index
    %c0_50 = arith.constant 0 : index
    %140 = vector.load %arg11[%c0_49, %c0_50] : memref<8x32xf32, #tpu.memory_space<vmem>>, vector<8x32xf32>
    %c0_51 = arith.constant 0 : index
    %c0_52 = arith.constant 0 : index
    %141 = vector.load %arg6[%c0_51, %c0_52] : memref<32x32xf32, #tpu.memory_space<vmem>>, vector<32x32xf32>
    %cst_53 = arith.constant dense<0.000000e+00> : vector<8x32xf32>
    %142 = tpu.matmul %140, %141, %cst_53 {dimension_numbers = #tpu.dot_dimension_numbers<[1], [0], [0], [1], [0, 0, 1, 1], [], []>} : vector<8x32xf32>, vector<32x32xf32>, vector<8x32xf32> -> vector<8x32xf32>
    %c0_54 = arith.constant 0 : index
    %c0_55 = arith.constant 0 : index
    %143 = vector.load %arg7[%c0_54, %c0_55] : memref<1x32xf32, #tpu.memory_space<vmem>>, vector<1x32xf32>
    %144 = vector.broadcast %143 : vector<1x32xf32> to vector<8x32xf32>
    %145 = arith.addf %142, %144 : vector<8x32xf32>
    %c0_56 = arith.constant 0 : index
    %c0_57 = arith.constant 0 : index
    %c0_58 = arith.constant 0 : index
    %146 = vector.load %arg8[%c0_56, %c0_57, %c0_58] : memref<1x8x32xf32, #tpu.memory_space<vmem>>, vector<1x8x32xf32>
    %147 = vector.shape_cast %146 : vector<1x8x32xf32> to vector<8x32xf32>
    %148 = vector.shape_cast %145 : vector<8x32xf32> to vector<1x8x32xf32>
    tpu.vector_store %arg8[%c0_56, %c0_57, %c0_58], %148 {strides = array<i32>} : memref<1x8x32xf32, #tpu.memory_space<vmem>>, vector<1x8x32xf32>,
    return
  }
  func.func @transform_0(%arg0: i32, %arg1: i32) -> (i32, i32, i32) {
    %c0_i32 = arith.constant 0 : i32
    %c0_i32_0 = arith.constant 0 : i32
    %c0_i32_1 = arith.constant 0 : i32
    return %arg0, %c0_i32, %c0_i32_0 : i32, i32, i32
  }
  func.func @transform_1(%arg0: i32, %arg1: i32) -> (i32, i32) {
    %c0_i32 = arith.constant 0 : i32
    %c0_i32_0 = arith.constant 0 : i32
    %c0_i32_1 = arith.constant 0 : i32
    return %c0_i32, %c0_i32_0 : i32, i32
  }
  func.func @transform_2(%arg0: i32, %arg1: i32) -> (i32, i32) {
    %c0_i32 = arith.constant 0 : i32
    %c0_i32_0 = arith.constant 0 : i32
    %c0_i32_1 = arith.constant 0 : i32
    return %c0_i32, %c0_i32_0 : i32, i32
  }
  func.func @transform_3(%arg0: i32, %arg1: i32) -> (i32, i32) {
    %c0_i32 = arith.constant 0 : i32
    %c0_i32_0 = arith.constant 0 : i32
    %c0_i32_1 = arith.constant 0 : i32
    return %c0_i32, %c0_i32_0 : i32, i32
  }
  func.func @transform_4(%arg0: i32, %arg1: i32) -> (i32, i32) {
    %c0_i32 = arith.constant 0 : i32
    %c0_i32_0 = arith.constant 0 : i32
    %c0_i32_1 = arith.constant 0 : i32
    return %c0_i32, %c0_i32_0 : i32, i32
  }
  func.func @transform_5(%arg0: i32, %arg1: i32) -> (i32, i32) {
    %c0_i32 = arith.constant 0 : i32
    %c0_i32_0 = arith.constant 0 : i32
    %c0_i32_1 = arith.constant 0 : i32
    return %c0_i32, %c0_i32_0 : i32, i32
  }
  func.func @transform_6(%arg0: i32, %arg1: i32) -> (i32, i32, i32) {
    %c0_i32 = arith.constant 0 : i32
    %c0_i32_0 = arith.constant 0 : i32
    return %arg0, %arg1, %c0_i32 : i32, i32, i32
  }
}

</mosaic_0001>

<bundles_post_ra>
// kernel: tpu_custom_call.1
= control target key start
LH: loop header
LB: loop body
LE: loop exit
PB: predicated region body
PF: predicated region fallthrough
CT: control target
= control target key end

     0   :  { %s3339_s0 = inlined_call_operand.hbm [shape: f32[2,8,32], index: 0, kind: input, shape index: {}]   ;;  %s3340_s1 = inlined_call_operand.hbm [shape: f32[32,32], index: 1, kind: input, shape index: {}]   ;;  %s3341_s2 = inlined_call_operand.hbm [shape: f32[32,32], index: 2, kind: input, shape index: {}]   ;;  %s3342_s3 = inlined_call_operand.hbm [shape: f32[32,32], index: 3, kind: input, shape index: {}]   ;;  %s3343_s4 = inlined_call_operand.hbm [shape: f32[32,32], index: 4, kind: input, shape index: {}]   ;;  %s3344_s5 = inlined_call_operand.vmem [shape: f32[1,32], index: 5, kind: input, shape index: {}]   ;;  %s3345_s6 = inlined_call_operand.hbm [shape: f32[2,8,32], index: 6, kind: output, shape index: {}]  }
   0x1   :  { %3351 = sst [smem:[#allocation19_spill]] %s3340_s1 }
   0x2   :  { %11 = vsyncpa [#allocation6], 0 }
   0x3   :  { %13 = vsyncpa [#allocation6 + $0x1], 0 }
   0x4   :  { %14 = vsyncpa [#allocation9], 0 }
   0x5   :  { %15 = vsyncpa [#allocation12], 0 }
   0x6   :  { %16 = vsyncpa [#allocation7], 0 }
   0x7   :  { %18 = vsyncpa [#allocation7 + $0x1], 0  ;;  %s2860_s21 = smov 0   ;;  %s2862_s22 = smov 0  }
   0x8   :  { %s2864_s23 = smov 0   ;;  %s2866_s24 = smov 0  }
   0x9   :  { %s2868_s25 = smov 0   ;;  %s2870_s26 = smov 0  }
   0xa LB: > { %s3346_s27 = sadd.s32 4294967295, %s2798_s26   ;;  %p2164_p0 = scmp.ge.s32.totalorder %s2798_s26, 1  ;;  %s2798_s26 = sphi %s2870_s26, %s24_s26   ;;  %s2794_s25 = sphi %s2868_s25, %s3373_s25   ;;  %s2790_s24 = sphi %s2866_s24, %s3372_s24   ;;  %s2786_s23 = sphi %s2864_s23, %s3371_s23   ;;  %s2782_s22 = sphi %s2862_s22, %s3370_s22   ;;  %s2778_s21 = sphi %s2860_s21, %s3369_s21  }
   0xb   : > { %p2894_p1 = scmp.eq.s32.totalorder %s3346_s27, 0  ;;  %p200_p2 = scmp.lt.s32.totalorder %s2798_s26, 3 }
   0xc   : > { %s2800_s30 = smov [#allocation8]   ;;  %s2801_s9 = smov [#allocation11]  }
   0xd   : > { %s3352_s28 = scalar_select %p2894_p1, 1, 0 }
   0xe   : > { %p2899_p3 = pnand %p2164_p0, %p200_p2  ;;  %s212_s7 = sshll.u32 %s2800_s30, 4  ;;  %s2903_s7 = int_to_ptr.vmem [resolvable:$true] %s212_s7 }
   0xf   : > { %s238_s10 = sshll.u32 %s2801_s9, 4  ;;  %s2802_s11 = smov [#allocation10]   ;;  %s2914_s10 = int_to_ptr.vmem [resolvable:$true] %s238_s10 }
  0x10   : > { %s3353_s29 = scalar_select %p2899_p3, 1, 0 }
  0x11   : > { %p2432_p4 = pneg %p2899_p3  ;;  %s2916_s12 = sshll.u32 %s2802_s11, 4  ;;  %s226_s12 = int_to_ptr.vmem [resolvable:$true] %s2916_s12 }
  0x12   : > { %s3355_s1 = sld [smem:[#allocation19_spill]] }
  0x13   : > { %p2910_p6 = pnand %p2432_p4, %p2894_p1 }
  0x15   : > { %p2926_p8 = pneg %p2910_p6 }
  0x18   : > { %s2566_s15 = scalar_lea.hbm %s3355_s1, 512 }
  0x19   : > { %p2567_p7 = scmp.ne.s32.totalorder %s3355_s1, %s2566_s15  ;;  %p2573_p11 = scmp.lt.u32.totalorder %s2566_s15, %s3355_s1 }
  0x1b   : > { %p2569_p9 = pnand %p2926_p8, %p2567_p7 }
  0x1d   : > { %p2570_p10 = pneg %p2569_p9 }
  0x1f   : > { %p2575_p12 = pnand %p2573_p11, %p2570_p10 }
  0x21   : > { %2578 = shalt.err (!%p2575_p12)
}
  0x22   : > { %s2579_s30 = scalar_lea.vmem %s2903_s7, 512  ;;  %p2587_p4 = scmp.lt.s32.totalorder %s2903_s7, %s2903_s7 }
  0x23   : > { %p2580_p13 = scmp.ne.s32.totalorder %s2903_s7, %s2579_s30  ;;  %p2588_p5 = scmp.lt.s32.totalorder %s2579_s30, %s2579_s30 }
  0x25   : > { %p2582_p0 = pnand %p2580_p13, %p2926_p8  ;;  %p2589_p7 = por %p2588_p5, %p2587_p4 }
  0x27   : > { %p2583_p2 = pneg %p2582_p0 }
  0x29   : > { %p2590_p9 = pnand %p2589_p7, %p2583_p2 }
  0x2b   : > { %2593 = shalt.err (!%p2590_p9)
}
  0x2c   : > { %s2803_s9 = smov 128   ;;  %s2804_s11 = smov 8  }
  0x2d   : > { %2435 = dma.hbm_to_vmem [thread:$0]  (!%p2910_p6), %s3355_s1, 512, %s2903_s7, [#allocation9], %s2803_s9, %s2803_s9, %s2804_s11  }
  0x2e   : > { %s2594_s17 = scalar_lea.hbm %s3342_s3, 512 }
  0x2f   : > { %p2595_p5 = scmp.ne.s32.totalorder %s3342_s3, %s2594_s17  ;;  %p2601_p12 = scmp.lt.u32.totalorder %s2594_s17, %s3342_s3 }
  0x31   : > { %p2597_p10 = pnand %p2595_p5, %p2926_p8 }
  0x33   : > { %p2598_p11 = pneg %p2597_p10 }
  0x35   : > { %p2603_p13 = pnand %p2601_p12, %p2598_p11 }
  0x37   : > { %2606 = shalt.err (!%p2603_p13)
}
  0x38   : > { %s2607_s7 = scalar_lea.vmem %s2914_s10, 512  ;;  %p2615_p7 = scmp.lt.s32.totalorder %s2914_s10, %s2914_s10 }
  0x39   : > { %p2608_p0 = scmp.ne.s32.totalorder %s2914_s10, %s2607_s7  ;;  %p2616_p9 = scmp.lt.s32.totalorder %s2607_s7, %s2607_s7 }
  0x3b   : > { %p2610_p2 = pnand %p2608_p0, %p2926_p8  ;;  %p2617_p5 = por %p2616_p9, %p2615_p7 }
  0x3d   : > { %p2611_p4 = pneg %p2610_p2 }
  0x3f   : > { %p2618_p10 = pnand %p2617_p5, %p2611_p4 }
  0x41   : > { %2621 = shalt.err (!%p2618_p10)
}
  0x42   : > { %2441 = dma.hbm_to_vmem [thread:$0]  (!%p2910_p6), %s3342_s3, 512, %s2914_s10, [#allocation12], %s2803_s9, %s2803_s9, %s2804_s11  }
  0x43   : > { %s2622_s16 = scalar_lea.hbm %s3341_s2, 512 }
  0x44   : > { %p2623_p11 = scmp.ne.s32.totalorder %s3341_s2, %s2622_s16  ;;  %p2629_p0 = scmp.lt.u32.totalorder %s2622_s16, %s3341_s2 }
  0x46   : > { %p2625_p12 = pnand %p2623_p11, %p2926_p8 }
  0x48   : > { %p2626_p13 = pneg %p2625_p12 }
  0x4a   : > { %p2631_p2 = pnand %p2629_p0, %p2626_p13 }
  0x4c   : > { %2634 = shalt.err (!%p2631_p2)
}
  0x4d   : > { %s2635_s7 = scalar_lea.vmem %s226_s12, 512  ;;  %p2643_p5 = scmp.lt.s32.totalorder %s226_s12, %s226_s12 }
  0x4e   : > { %p2636_p4 = scmp.ne.s32.totalorder %s226_s12, %s2635_s7  ;;  %p2644_p10 = scmp.lt.s32.totalorder %s2635_s7, %s2635_s7 }
  0x50   : > { %p2638_p7 = pnand %p2636_p4, %p2926_p8  ;;  %p2645_p3 = por %p2644_p10, %p2643_p5 }
  0x52   : > { %p2639_p9 = pneg %p2638_p7 }
  0x54   : > { %p2646_p1 = pnand %p2645_p3, %p2639_p9 }
  0x56   : > { %2649 = shalt.err (!%p2646_p1)
}
  0x57   : > { %2438 = dma.hbm_to_vmem [thread:$0]  (!%p2910_p6), %s3341_s2, 512, %s226_s12, [#allocation9], %s2803_s9, %s2803_s9, %s2804_s11  }
  0x58   : > { %s2805_s13 = smov [#allocation13]   ;;  %s2650_s17 = scalar_lea.hbm %s3343_s4, 512 }
  0x59   : > { %s251_s14 = sshll.u32 %s2805_s13, 4  ;;  %p2651_p1 = scmp.ne.s32.totalorder %s3343_s4, %s2650_s17  ;;  %s252_s14 = int_to_ptr.vmem [resolvable:$true] %s251_s14 }
  0x5a   : > { %p2657_p12 = scmp.lt.u32.totalorder %s2650_s17, %s3343_s4 }
  0x5b   : > { %p2653_p3 = pnand %p2651_p1, %p2926_p8 }
  0x5d   : > { %p2654_p11 = pneg %p2653_p3 }
  0x5f   : > { %p2659_p13 = pnand %p2657_p12, %p2654_p11 }
  0x61   : > { %2662 = shalt.err (!%p2659_p13)
}
  0x62   : > { %s2663_s12 = scalar_lea.vmem %s252_s14, 512  ;;  %p2671_p7 = scmp.lt.s32.totalorder %s252_s14, %s252_s14 }
  0x63   : > { %p2664_p0 = scmp.ne.s32.totalorder %s252_s14, %s2663_s12  ;;  %p2672_p9 = scmp.lt.s32.totalorder %s2663_s12, %s2663_s12 }
  0x65   : > { %p2666_p2 = pnand %p2664_p0, %p2926_p8  ;;  %p2673_p5 = por %p2672_p9, %p2671_p7 }
  0x67   : > { %p2667_p4 = pneg %p2666_p2 }
  0x69   : > { %p2674_p10 = pnand %p2673_p5, %p2667_p4 }
  0x6b   : > { %2677 = shalt.err (!%p2674_p10)
}
  0x6c   : > { %2444 = dma.hbm_to_vmem [thread:$0]  (!%p2910_p6), %s3343_s4, 512, %s252_s14, [#allocation12], %s2803_s9, %s2803_s9, %s2804_s11  }
  0x6d   : > { %s2163_s8 = sadd.s32 4294967294, %s2798_s26   ;;  %s36_s18 = sadd.s32 1, %s2794_s25 }
  0x6e   : > { %p38_p8 = scmp.ge.s32.totalorder %s36_s18, 2  ;;  %s43_s13 = sadd.s32 1, %s2786_s23 }
  0x6f   : > { %p50_p1 = scmp.ne.s32.totalorder %s2786_s23, %s2782_s22  ;;  %p51_p3 = scmp.eq.s32.totalorder %s2798_s26, 0 }
  0x70   : > { %s3375_s18 = smov (%p38_p8, %s36_s18), 0  ;;  %p56_p12 = scmp.ne.s32.totalorder %s2782_s22, %s2778_s21 }
  0x71   : > { %p3027_p11 = por %p51_p3, %p50_p1  ;;  %s40_s9 = ssub.s32 %s2794_s25, %s3375_s18 }
  0x72   : > { %s3358_s11 = sadd.s32 4294967295, %s2798_s26   ;;  %p41_p13 = scmp.eq.s32.totalorder %s40_s9, 0 }
  0x73   : > { %p187_p6 = scmp.eq.s32.totalorder %s3358_s11, 1  ;;  %p3359_p0 = scmp.ne.s32.totalorder %s3352_s28, 0 }
  0x74   : > { %p193_p7 = scmp.eq.s32.totalorder %s2163_s8, 1  ;;  %p2457_p5 = scmp.lt.s32.totalorder %s2798_s26, 2 }
  0x75   : > { %p3039_p2 = por %p3359_p0, %p56_p12  ;;  %p3043_p4 = por %p187_p6, %p50_p1 }
  0x76   : > { %s3048_s17 = scalar_select %p41_p13, %s2786_s23, %s43_s13  }
  0x77   : > { %s3361_s16 = scalar_select %p3043_p4, 1, 0 }
  0x78   : > { %p3050_p9 = por %p193_p7, %p56_p12  ;;  %s268_s20 = sand.u32 1, %s2786_s23  }
  0x79   : > { %s2171_s30 = sshll.u32 %s2794_s25, 7  ;;  %s2170_s7 = sshll.u32 %s268_s20, 3 }
  0x7a   : > { %s3362_s19 = scalar_select %p3050_p9, 1, 0 }
  0x7b   : > { %s3060_s27 = scalar_lea.hbm %s3339_s0, %s2171_s30  ;;  %s272_s8 = scalar_lea.vmem [#allocation5], %s2170_s7 }
  0x7c   : > { %s279_s13 = sshll.u32 %s272_s8, 4  ;;  %p3064_p10 = pnand %p2457_p5, %p3027_p11  ;;  %s3068_s13 = int_to_ptr.vmem [resolvable:$true] %s279_s13 }
  0x7d   : > { %s269_s11 = scalar_lea.sflag [#allocation6], %s268_s20  ;;  %s2678_s1 = scalar_lea.hbm %s3060_s27, 128 }
  0x7e   : > { %p2679_p8 = scmp.ne.s32.totalorder %s3060_s27, %s2678_s1  ;;  %p2680_p1 = pneg %p3064_p10 }
  0x7f   : > { %s2683_s15 = scalar_lea.hbm %s3339_s0, 256  ;;  %p2684_p11 = scmp.lt.u32.totalorder %s3060_s27, %s3339_s0 }
  0x80   : > { %p2681_p3 = pnand %p2680_p1, %p2679_p8  ;;  %p2685_p6 = scmp.lt.u32.totalorder %s2683_s15, %s2678_s1 }
  0x81   : > { %p2687_p0 = scmp.lt.u32.totalorder %s2678_s1, %s3060_s27 }
  0x82   : > { %p2682_p12 = pneg %p2681_p3  ;;  %p2686_p13 = por %p2685_p6, %p2684_p11 }
  0x84   : > { %p2688_p7 = por %p2687_p0, %p2686_p13 }
  0x86   : > { %p2689_p5 = pnand %p2688_p7, %p2682_p12 }
  0x88   : > { %2692 = shalt.err (!%p2689_p5)
}
  0x89   : > { %s2693_s20 = scalar_lea.vmem %s3068_s13, 128  ;;  %s2806_s8 = smov [#allocation5]  }
  0x8a   : > { %p2694_p8 = scmp.ne.s32.totalorder %s3068_s13, %s2693_s20  ;;  %s2698_s30 = sshll.u32 %s2806_s8, 4  ;;  %s2699_s30 = int_to_ptr.vmem [resolvable:$false] %s2698_s30 }
  0x8b   : > { %s2700_s7 = scalar_lea.vmem %s2699_s30, 256  ;;  %p2701_p4 = scmp.lt.s32.totalorder %s3068_s13, %s2699_s30 }
  0x8c   : > { %p2696_p3 = pnand %p2694_p8, %p2680_p1  ;;  %p2702_p11 = scmp.lt.s32.totalorder %s2700_s7, %s2693_s20 }
  0x8e   : > { %p2697_p9 = pneg %p2696_p3  ;;  %p2703_p6 = por %p2702_p11, %p2701_p4 }
  0x90   : > { %p2704_p13 = pnand %p2703_p6, %p2697_p9 }
  0x92   : > { %2707 = shalt.err (!%p2704_p13)
}
  0x93   : > { %2448 = dma.hbm_to_vmem [thread:$0]  (!%p3064_p10), %s3060_s27, 128, %s3068_s13, %s269_s11  }
  0x94   : > { %p3364_p12 = scmp.ne.s32.totalorder %s3353_s29, 0 }
  0x95   : > { %s3098_s1 = sand.u32 (!%p3364_p12), 1, %s2782_s22  }
  0x96   : > { %288 = sbr.rel (%p3364_p12) target bundleno = 1730 (0x6c2), region = 44  ;;  %s2173_s15 = sshll.u32 (!%p3364_p12), %s3098_s1, 3 }
  0x97   : > { %s291_s12 = scalar_lea.sflag (!%p3364_p12), [#allocation6], %s3098_s1  ;;  %s294_s10 = scalar_lea.vmem (!%p3364_p12), [#allocation5], %s2173_s15 }
  0x9d   : > { %2761 = dma.done.wait (%p3039_p2), %s291_s12, 128  }
  0x9e   : > { %2763 = vsyncadd (%p3039_p2), %s291_s12, 4294967168  ;;  %p3365_p4 = scmp.ne.s32.totalorder %s3352_s28, 0 }
  0xa0   : > { %2765 = dma.done.wait (%p3365_p4), [#allocation9], 1024  }
  0xa1   : > { %2767 = vsyncadd (%p3365_p4), [#allocation9], 4294966272 }
  0xa2   : > { %2769 = dma.done.wait (%p3365_p4), [#allocation12], 1024  }
  0xa3   : > { %2771 = vsyncadd (%p3365_p4), [#allocation12], 4294966272  ;;  %v2807_v0 = vmov 0.0|0.0   ;;  %vm2808_vm0 = vmmov 0   ;;  %v2809_v1 = vmov 0.0   ;;  %v344_v2 = vld [vmem:[#allocation10] sm:$0xff] }
  0xa4   : > { %2388 = vmatprep.subr.bf16.mxu0 %v2807_v0  ;;  %2272 = vmatprep.mubr.msk.f32.mxu0 %vm2808_vm0, %v2809_v1  ;;  %v345_v3 = vld [vmem:[#allocation10 + $0x8] sm:$0xff]  ;;  %v346_v4 = vld [vmem:[#allocation10 + $0x10] sm:$0xff]  ;;  %v347_v6 = vld [vmem:[#allocation10 + $0x18] sm:$0xff]  ;;  %vm348_vm1 = vcmask 261120   ;;  %vm581_vm2 = vcmask 31744   ;;  %s2810_s28 = smov 124  }
  0xa5   : > { %2394 = vmatprep.subr.bf16.mxu1 %v2807_v0  ;;  %2283 = vmatprep.mubr.msk.f32.mxu1 %vm2808_vm0, %v2809_v1  ;;  %v2389_v5 = vpack.c.bf16 %v345_v3, %v344_v2  ;;  %v2392_v7 = vpack.c.bf16 %v347_v6, %v346_v4  ;;  %v423_v8 = vld [vmem:[#allocation11] sm:$0xff]  ;;  %v424_v9 = vld [vmem:[#allocation11 + $0x8] sm:$0xff]  ;;  %v343_v13 = vld [vmem:[%s294_s10] sm:$0xff]  ;;  %s2811_s29 = smov 120   ;;  %s2812_s14 = smov 116   ;;  %vm658_vm3 = vcmask 64512  }
  0xa6   : > { %v501_v10 = vld [vmem:[#allocation8] sm:$0xff]  ;;  %v502_v11 = vld [vmem:[#allocation8 + $0x8] sm:$0xff]  ;;  %v2395_v12 = vpack.c.bf16 %v424_v9, %v423_v8  ;;  %v503_v15 = vld [vmem:[#allocation8 + $0x10] sm:$0xff]  ;;  %s2813_s27 = smov 112   ;;  %s2814_s13 = smov 108   ;;  %vm914_vm4 = vcmask 64544  }
  0xa7   : > { %2390 = vmatpush3.bf16.msra.mxu0 %v2389_v5  ;;  %v2401_v14 = vpack.c.bf16 %v502_v11, %v501_v10  ;;  %v504_v16 = vld [vmem:[#allocation8 + $0x18] sm:$0xff]  ;;  %v425_v18 = vld [vmem:[#allocation11 + $0x10] sm:$0xff]  ;;  %s2815_s9 = smov 104   ;;  %s2816_s11 = smov 100   ;;  %vm1085_vm5 = vcmask 97344   ;;  %vm1256_vm6 = vcmask 130144  }
  0xa8   : > { %2391 = vmatprep.subr.bf16.mxu0 %v2807_v0  ;;  %2396 = vmatpush3.bf16.msra.mxu1 %v2395_v12  ;;  %v2404_v17 = vpack.c.bf16 %v504_v16, %v503_v15  ;;  %v426_v19 = vld [vmem:[#allocation11 + $0x18] sm:$0xff]  ;;  %s2817_s20 = smov 4   ;;  %s2818_s8 = smov 8   ;;  %vm1427_vm7 = vcmask 162944   ;;  %vm1598_vm8 = vcmask 195744   ;;  %vm1769_vm9 = vcmask 228544  }
  0xa9   : > { %2397 = vmatprep.subr.bf16.mxu1 %v2807_v0  ;;  %v2398_v20 = vpack.c.bf16 %v426_v19, %v425_v18  ;;  %s2819_s30 = smov 12   ;;  %s2820_s7 = smov 16   ;;  %vm1940_vm10 = vcmask 261344  }
  0xaa   : > { %s2821_s12 = smov 20   ;;  %s2822_s10 = smov 24  }
  0xab   : > { %2393 = vmatpush3.bf16.msra.mxu0 %v2392_v7  ;;  %p3366_p9 = scmp.ne.s32.totalorder %s3361_s16, 0 }
  0xac   : > { %2400 = vmatprep.subr.bf16.mxu0 %v2807_v0  ;;  %2399 = vmatpush3.bf16.msra.mxu1 %v2398_v20 }
  0xad   : > { %2297 = vmatprep.subr.mxu1 %v2809_v1 }
  0xae   : > { %2273 = vmatmul.mubr.msk.f32.vlgmr.msra.gmra.mrb[0].mxu0 %vm348_vm1, %v343_v13 }
  0xaf   : > { %2402 = vmatpush3.bf16.msra.mxu0 %v2401_v14  ;;  %2294 = vmatprep.mubr.msk.f32.mxu0 %vm2808_vm0, %v2809_v1 }
  0xb0   : > { %2403 = vmatprep.subr.bf16.mxu0 %v2807_v0  ;;  %2284 = vmatmul.mubr.msk.f32.vlgmr.msra.gmra.mrb[0].mxu1 %vm348_vm1, %v343_v13 }
  0xb1   : > { %2299 = vmatprep.mubr.msk.f32.mxu1 %vm2808_vm0, %v2809_v1 }
  0xb3   : > { %2405 = vmatpush3.bf16.msra.mxu0 %v2404_v17 }
  0xb4   : > { %2317 = vmatprep.subr.mxu0 %v2809_v1 }
  0xb6   : > { %2295 = vmatmul.mubr.msk.f32.vlgmr.msra.gmra.mrb[2].mxu0 %vm348_vm1, %v343_v13 }
  0xb7   : > { %2319 = vmatprep.mubr.msk.f32.mxu0 %vm2808_vm0, %v2809_v1 }
 0x181   : > { %v418_v21 = vpop.f32.mrb[0].mxu0 }
 0x182   : > { %422 = vst.msk [vmem:[#allocation2] sm:$0xff] %vm348_vm1, %v418_v21  ;;  %v2274_v22 = vpop.f32.mrb[1].mxu0 }
 0x183   : > { %v493_v26 = vpop.f32.mrb[0].mxu1 }
 0x184   : > { %497 = vst.msk [vmem:[#allocation3] sm:$0xff] %vm348_vm1, %v493_v26  ;;  %v2285_v27 = vpop.f32.mrb[1].mxu1 }
 0x189   : > { %v575_v23 = vpop.f32.mrb[2].mxu0  ;;  %v579_v24 = vld [vmem:[#allocation2] sm:$0xff] }
 0x18a   : > { %2298 = vmatpush3.xpose.msk.msra.mxu1 %vm581_vm2, %v579_v24  ;;  %744 = vrot.lane.b32.xlu1 %v575_v23, %s2810_s28  ;;  %v2296_v25 = vpop.f32.mrb[3].mxu0 }
 0x18b   : > { %2302 = vmatprep.subr.mxu1 %v2809_v1  ;;  %v3154_v28 = vld [vmem:[#allocation3] sm:$0xff] }
 0x18d   : > { %2300 = vmatmul.mubr.msk.f32.vlgmr.msra.gmra.mrb[2].mxu1 %vm581_vm2, %v575_v23 }
 0x18e   : > { %918 = vrot.lane.b32.xlu1 %v579_v24, %s2811_s29  ;;  %2304 = vmatprep.mubr.msk.f32.mxu1 %vm2808_vm0, %v2809_v1 }
 0x18f   : > { %2303 = vmatpush3.msra.mxu1 %v3154_v28 }
 0x190   : > { %2307 = vmatprep.subr.mxu1 %v2809_v1 }
 0x192   : > { %916 = vrot.lane.b32.xlu1 %v575_v23, %s2811_s29 }
 0x196   : > { %1089 = vrot.lane.b32.xlu1 %v579_v24, %s2812_s14 }
 0x19a   : > { %1087 = vrot.lane.b32.xlu1 %v575_v23, %s2812_s14 }
 0x19e   : > { %1260 = vrot.lane.b32.xlu1 %v579_v24, %s2813_s27 }
 0x1a2   : > { %1258 = vrot.lane.b32.xlu1 %v575_v23, %s2813_s27 }
 0x1a6   : > { %1429 = vrot.lane.b32.xlu1 %v575_v23, %s2814_s13 }
 0x1aa   : > { %1600 = vrot.lane.b32.xlu1 %v575_v23, %s2815_s9 }
 0x1ae   : > { %1771 = vrot.lane.b32.xlu1 %v575_v23, %s2816_s11 }
 0x1fc   : > { %v3158_v29 = vpop.permute.xlu1 %744 }
 0x200   : > { %v919_v30 = vpop.permute.xlu1 %918 }
 0x201   : > { %2318 = vmatpush3.xpose.msk.msra.mxu0 %vm581_vm2, %v919_v30 }
 0x202   : > { %2327 = vmatprep.subr.mxu0 %v2809_v1 }
 0x204   : > { %v917_v31 = vpop.permute.xlu1 %916 }
 0x205   : > { %2320 = vmatmul.mubr.msk.f32.vlgmr.msra.gmra.mrb[4].mxu0 %vm581_vm2, %v917_v31 }
 0x206   : > { %2329 = vmatprep.mubr.msk.f32.mxu0 %vm2808_vm0, %v2809_v1 }
 0x208   : > { %v1090_v32 = vpop.permute.xlu1 %1089 }
 0x209   : > { %2328 = vmatpush3.xpose.msk.msra.mxu0 %vm581_vm2, %v1090_v32 }
 0x20a   : > { %2337 = vmatprep.subr.mxu0 %v2809_v1 }
 0x20c   : > { %v1088_v33 = vpop.permute.xlu1 %1087 }
 0x20d   : > { %2330 = vmatmul.mubr.msk.f32.vlgmr.msra.gmra.mrb[6].mxu0 %vm581_vm2, %v1088_v33 }
 0x20e   : > { %2339 = vmatprep.mubr.msk.f32.mxu0 %vm2808_vm0, %v2809_v1 }
 0x210   : > { %v1261_v34 = vpop.permute.xlu1 %1260 }
 0x211   : > { %2338 = vmatpush3.xpose.msk.msra.mxu0 %vm581_vm2, %v1261_v34 }
 0x212   : > { %2347 = vmatprep.subr.mxu0 %v2809_v1 }
 0x214   : > { %v1259_v35 = vpop.permute.xlu1 %1258 }
 0x215   : > { %2340 = vmatmul.mubr.msk.f32.vlgmr.msra.gmra.mrb[8].mxu0 %vm581_vm2, %v1259_v35 }
 0x216   : > { %2349 = vmatprep.mubr.msk.f32.mxu0 %vm2808_vm0, %v2809_v1 }
 0x218   : > { %v1430_v52 = vpop.permute.xlu1 %1429 }
 0x21c   : > { %v1601_v55 = vpop.permute.xlu1 %1600 }
 0x220   : > { %v1772_v58 = vpop.permute.xlu1 %1771 }
 0x260   : > { %v654_v36 = vpop.f32.mrb[2].mxu1 }
 0x261   : > { %v2301_v37 = vpop.f32.mrb[3].mxu1  ;;  %v659_v38 = vsel %vm658_vm3, %v654_v36, -inf }
 0x262   : > { %660 = vmax.xlane.f32.xlu0 %v659_v38 }
 0x278   : > { %746 = vrot.lane.b32.xlu0 %v579_v24, %s2810_s28 }
 0x27c   : > { %1431 = vrot.lane.b32.xlu0 %v579_v24, %s2814_s13 }
 0x280   : > { %1602 = vrot.lane.b32.xlu0 %v579_v24, %s2815_s9 }
 0x284   : > { %1773 = vrot.lane.b32.xlu0 %v579_v24, %s2816_s11 }
 0x2d8   : > { %v3180_v39 = vpop.f32.mrb[4].mxu0 }
 0x2d9   : > { %v2321_v40 = vpop.f32.mrb[5].mxu0  ;;  %v994_v41 = vsel %vm658_vm3, %v3180_v39, -inf }
 0x2da   : > { %995 = vmax.xlane.f32.xlu1 %v994_v41 }
 0x2e0   : > { %v3184_v42 = vpop.f32.mrb[6].mxu0 }
 0x2e1   : > { %v2331_v43 = vpop.f32.mrb[7].mxu0  ;;  %v1165_v44 = vsel %vm658_vm3, %v3184_v42, -inf }
 0x2e2   : > { %1166 = vmax.xlane.f32.xlu0 %v1165_v44 }
 0x2e8   : > { %v3188_v45 = vpop.f32.mrb[8].mxu0 }
 0x2e9   : > { %v2341_v46 = vpop.f32.mrb[9].mxu0  ;;  %v1336_v47 = vsel %vm658_vm3, %v3188_v45, -inf }
 0x2ea   : > { %1337 = vmax.xlane.f32.xlu0 %v1336_v47 }
 0x2ef   : > { %v661_v48 = vpop.xlane.xlu0 %660 }
 0x2f0   : > { %v662_v49 = vsub.f32 %v654_v36, %v661_v48 }
 0x2f2   : > { %v663_v50 = vmul.f32 1.442695, %v662_v49 }
 0x2f3   : > { %v747_v51 = vpop.permute.xlu0 %746 }
 0x2f4   : > { %2534 = vpow2.f32 %v663_v50 }
 0x2f7   : > { %v1432_v53 = vpop.permute.xlu0 %1431 }
 0x2f8   : > { %2348 = vmatpush3.xpose.msk.msra.mxu0 %vm581_vm2, %v1432_v53 }
 0x2f9   : > { %2357 = vmatprep.subr.mxu0 %v2809_v1 }
 0x2fb   : > { %2350 = vmatmul.mubr.msk.f32.vlgmr.msra.gmra.mrb[10].mxu0 %vm581_vm2, %v1430_v52  ;;  %v1603_v54 = vpop.permute.xlu0 %1602 }
 0x2fc   : > { %2358 = vmatpush3.xpose.msk.msra.mxu0 %vm581_vm2, %v1603_v54  ;;  %2359 = vmatprep.mubr.msk.f32.mxu0 %vm2808_vm0, %v2809_v1 }
 0x2fd   : > { %2367 = vmatprep.subr.mxu0 %v2809_v1 }
 0x2fe   : > { %v3199_v56 = vpop.eup %2534 }
 0x2ff   : > { %2305 = vmatmul.mubr.msk.f32.vlgmr.msra.gmra.mrb[4].mxu1 %vm658_vm3, %v3199_v56  ;;  %2360 = vmatmul.mubr.msk.f32.vlgmr.msra.gmra.mrb[12].mxu0 %vm581_vm2, %v1601_v55  ;;  %v1774_v57 = vpop.permute.xlu0 %1773 }
 0x300   : > { %2308 = vmatpush3.xpose.msk.msra.mxu1 %vm581_vm2, %v747_v51  ;;  %2368 = vmatpush3.xpose.msk.msra.mxu0 %vm581_vm2, %v1774_v57  ;;  %v665_v51 = vsel %vm658_vm3, %v3199_v56, 0.0 }
 0x301   : > { %2309 = vmatprep.mubr.msk.f32.mxu1 %vm2808_vm0, %v2809_v1  ;;  %2369 = vmatprep.mubr.msk.f32.mxu0 %vm2808_vm0, %v2809_v1 }
 0x302   : > { %2312 = vmatprep.subr.mxu1 %v2809_v1  ;;  %2406 = vmatprep.subr.bf16.mxu0 %v2807_v0 }
 0x303   : > { %2310 = vmatmul.mubr.msk.f32.vlgmr.msra.gmra.mrb[6].mxu1 %vm581_vm2, %v3158_v29  ;;  %2370 = vmatmul.mubr.msk.f32.vlgmr.msra.gmra.mrb[14].mxu0 %vm581_vm2, %v1772_v58 }
 0x304   : > { %2314 = vmatprep.mubr.msk.f32.mxu1 %vm2808_vm0, %v2809_v1  ;;  %2385 = vmatprep.mubr.msk.f32.mxu0 %vm2808_vm0, %v2809_v1 }
 0x367   : > { %v996_v13 = vpop.xlane.xlu1 %995 }
 0x368   : > { %v997_v14 = vsub.f32 %v3180_v39, %v996_v13 }
 0x36a   : > { %v998_v16 = vmul.f32 1.442695, %v997_v14 }
 0x36f   : > { %v1167_v11 = vpop.xlane.xlu0 %1166 }
 0x370   : > { %v1168_v12 = vsub.f32 %v3184_v42, %v1167_v11 }
 0x372   : > { %v1169_v15 = vmul.f32 1.442695, %v1168_v12 }
 0x374   : > { %2536 = vpow2.f32 %v1169_v15 }
 0x375   : > { %2538 = vpow2.f32 %v998_v16 }
 0x377   : > { %v1338_v21 = vpop.xlane.xlu0 %1337 }
 0x378   : > { %v1339_v26 = vsub.f32 %v3188_v45, %v1338_v21  ;;  %v1946_v21 = vld [vmem:[#allocation13 + $0x18] sm:$0xff] }
 0x37a   : > { %v1340_v31 = vmul.f32 1.442695, %v1339_v26 }
 0x37e   : > { %v2537_v17 = vpop.eup %2536 }
 0x37f   : > { %v1171_v18 = vsel %vm658_vm3, %v2537_v17, 0.0  ;;  %v2539_v19 = vpop.eup %2538 }
 0x380   : > { %v1000_v20 = vsel %vm658_vm3, %v2539_v19, 0.0 }
 0x3ce   : > { %v1503_v59 = vpop.f32.mrb[10].mxu0 }
 0x3cf   : > { %v2351_v60 = vpop.f32.mrb[11].mxu0  ;;  %v1507_v61 = vsel %vm658_vm3, %v1503_v59, -inf }
 0x3d0   : > { %1508 = vmax.xlane.f32.xlu1 %v1507_v61 }
 0x3d2   : > { %v3220_v62 = vpop.f32.mrb[4].mxu1  ;;  %v1674_v63 = vpop.f32.mrb[12].mxu0 }
 0x3d3   : > { %v2306_v2 = vpop.f32.mrb[5].mxu1  ;;  %v2361_v3 = vpop.f32.mrb[13].mxu0  ;;  %v1678_v4 = vsel %vm658_vm3, %v1674_v63, -inf }
 0x3d4   : > { %1679 = vmax.xlane.f32.xlu0 %v1678_v4 }
 0x3d6   : > { %v818_v5 = vpop.f32.mrb[6].mxu1  ;;  %v1845_v6 = vpop.f32.mrb[14].mxu0 }
 0x3d7   : > { %v2311_v7 = vpop.f32.mrb[7].mxu1  ;;  %v2371_v8 = vpop.f32.mrb[15].mxu0  ;;  %v822_v9 = vsel %vm658_vm3, %v818_v5, -inf  ;;  %v1849_v10 = vsel %vm658_vm3, %v1845_v6, -inf }
 0x3d8   : > { %823 = vmax.xlane.f32.xlu0 %v822_v9  ;;  %1850 = vmax.xlane.f32.xlu1 %v1849_v10 }
 0x3e9   : > { %1003 = vrot.lane.b32.xlu1 %v3154_v28, %s2811_s29 }
 0x3ed   : > { %1174 = vrot.lane.b32.xlu1 %v3154_v28, %s2812_s14 }
 0x3ee   : > { %832 = vrot.lane.b32.xlu0 %v3154_v28, %s2810_s28  ;;  %s2823_s28 = smov 28  }
 0x3f1   : > { %1516 = vrot.lane.b32.xlu1 %v3154_v28, %s2814_s13  ;;  %s338_s13 = scalar_lea.vmem [#allocation14], %s2173_s15  ;;  %s2824_s15 = smov [#allocation14]  }
 0x3f2   : > { %1345 = vrot.lane.b32.xlu0 %v3154_v28, %s2813_s27  ;;  %s2209_s27 = sshll.u32 %s2790_s24, 7 }
 0x3f5   : > { %1858 = vrot.lane.b32.xlu1 %v3154_v28, %s2816_s11 }
 0x3f6   : > { %1687 = vrot.lane.b32.xlu0 %v3154_v28, %s2815_s9  ;;  %s2043_s9 = sshll.u32 %s338_s13, 4  ;;  %s3291_s9 = int_to_ptr.vmem [resolvable:$true] %s2043_s9 }
 0x3f7   : > { %s2708_s24 = scalar_lea.vmem %s3291_s9, 128 }
 0x3f8   : > { %p2709_p2 = scmp.ne.s32.totalorder %s3291_s9, %s2708_s24 }
 0x3fa   : > { %p2710_p10 = pnand %p2709_p2, %p3366_p9 }
 0x3fc   : > { %p2711_p1 = pneg %p2710_p10 }
 0x415   : > { %1172 = vadd.xlane.f32.xlu0 %v1171_v18  ;;  %v1944_v18 = vld [vmem:[#allocation13 + $0x8] sm:$0xff] }
 0x419   : > { %1001 = vadd.xlane.f32.xlu1 %v1000_v20  ;;  %v1945_v20 = vld [vmem:[#allocation13 + $0x10] sm:$0xff] }
 0x45d   : > { %v1509_v22 = vpop.xlane.xlu1 %1508 }
 0x45e   : > { %v1510_v23 = vsub.f32 %v1503_v59, %v1509_v22 }
 0x460   : > { %v1511_v24 = vmul.f32 1.442695, %v1510_v23 }
 0x461   : > { %v1680_v25 = vpop.xlane.xlu0 %1679 }
 0x462   : > { %2540 = vpow2.f32 %v1511_v24  ;;  %v1681_v32 = vsub.f32 %v1674_v63, %v1680_v25  ;;  %v2410_v24 = vpack.c.bf16 %v1946_v21, %v1945_v20 }
 0x464   : > { %v1682_v37 = vmul.f32 1.442695, %v1681_v32 }
 0x465   : > { %v824_v27 = vpop.xlane.xlu0 %823  ;;  %v1851_v28 = vpop.xlane.xlu1 %1850 }
 0x466   : > { %v825_v29 = vsub.f32 %v818_v5, %v824_v27  ;;  %v1852_v30 = vsub.f32 %v1845_v6, %v1851_v28 }
 0x468   : > { %v826_v33 = vmul.f32 1.442695, %v825_v29  ;;  %v1853_v34 = vmul.f32 1.442695, %v1852_v30 }
 0x469   : > { %v833_v35 = vpop.permute.xlu0 %832  ;;  %v1004_v39 = vpop.permute.xlu1 %1003 }
 0x46a   : > { %2542 = vpow2.f32 %v826_v33  ;;  %2313 = vmatpush3.msra.mxu1 %v833_v35 }
 0x46b   : > { %2544 = vpow2.f32 %v1853_v34  ;;  %2322 = vmatprep.subr.mxu1 %v2809_v1 }
 0x46c   : > { %v2541_v36 = vpop.eup %2540  ;;  %2546 = vpow2.f32 %v1340_v31 }
 0x46d   : > { %v1513_v38 = vsel %vm658_vm3, %v2541_v36, 0.0  ;;  %2548 = vpow2.f32 %v1682_v37  ;;  %v1175_v45 = vpop.permute.xlu1 %1174  ;;  %v1346_v48 = vpop.permute.xlu0 %1345 }
 0x46e   : > { %1514 = vadd.xlane.f32.xlu1 %v1513_v38 }
 0x471   : > { %v1517_v50 = vpop.permute.xlu1 %1516  ;;  %v1688_v52 = vpop.permute.xlu0 %1687 }
 0x474   : > { %v2543_v40 = vpop.eup %2542 }
 0x475   : > { %v2545_v41 = vpop.eup %2544  ;;  %2315 = vmatmul.mubr.msk.f32.vlgmr.msra.gmra.mrb[8].mxu1 %vm658_vm3, %v2543_v40  ;;  %v828_v42 = vsel %vm658_vm3, %v2543_v40, 0.0  ;;  %v1859_v53 = vpop.permute.xlu1 %1858 }
 0x476   : > { %v2547_v43 = vpop.eup %2546  ;;  %2323 = vmatpush3.msra.mxu1 %v1004_v39  ;;  %829 = vadd.xlane.f32.xlu0 %v828_v42  ;;  %v1855_v44 = vsel %vm658_vm3, %v2545_v41, 0.0  ;;  %v2206_v42 = vld [vmem:[%s3344_s5] ss:$0 sm:$0xff] }
 0x477   : > { %1856 = vadd.xlane.f32.xlu1 %v1855_v44  ;;  %2324 = vmatprep.mubr.msk.f32.mxu1 %vm2808_vm0, %v2809_v1  ;;  %v1342_v46 = vsel %vm658_vm3, %v2547_v43, 0.0  ;;  %v2549_v47 = vpop.eup %2548 }
 0x478   : > { %2332 = vmatprep.subr.mxu1 %v2809_v1  ;;  %v1684_v49 = vsel %vm658_vm3, %v2549_v47, 0.0 }
 0x479   : > { %2325 = vmatmul.mubr.msk.f32.vlgmr.msra.gmra.mrb[10].mxu1 %vm658_vm3, %v2539_v19 }
 0x47a   : > { %2333 = vmatpush3.msra.mxu1 %v1175_v45  ;;  %1343 = vadd.xlane.f32.xlu0 %v1342_v46 }
 0x47b   : > { %2334 = vmatprep.mubr.msk.f32.mxu1 %vm2808_vm0, %v2809_v1  ;;  %2342 = vmatprep.subr.mxu1 %v2809_v1 }
 0x47d   : > { %2335 = vmatmul.mubr.msk.f32.vlgmr.msra.gmra.mrb[12].mxu1 %vm658_vm3, %v2537_v17  ;;  %v1943_v17 = vld [vmem:[#allocation13] sm:$0xff] }
 0x47e   : > { %2343 = vmatpush3.msra.mxu1 %v1346_v48  ;;  %1685 = vadd.xlane.f32.xlu0 %v1684_v49  ;;  %v2407_v19 = vpack.c.bf16 %v1944_v18, %v1943_v17 }
 0x47f   : > { %2344 = vmatprep.mubr.msk.f32.mxu1 %vm2808_vm0, %v2809_v1  ;;  %2352 = vmatprep.subr.mxu1 %v2809_v1 }
 0x480   : > { %2408 = vmatpush3.bf16.msra.mxu0 %v2407_v19 }
 0x481   : > { %2345 = vmatmul.mubr.msk.f32.vlgmr.msra.gmra.mrb[14].mxu1 %vm658_vm3, %v2547_v43  ;;  %2409 = vmatprep.subr.bf16.mxu0 %v2807_v0 }
 0x482   : > { %2353 = vmatpush3.msra.mxu1 %v1517_v50  ;;  %666 = vadd.xlane.f32.xlu0 %v665_v51 }
 0x483   : > { %2354 = vmatprep.mubr.msk.f32.mxu1 %vm2808_vm0, %v2809_v1  ;;  %2362 = vmatprep.subr.mxu1 %v2809_v1 }
 0x484   : > { %2411 = vmatpush3.bf16.msra.mxu0 %v2410_v24 }
 0x485   : > { %2355 = vmatmul.mubr.msk.f32.vlgmr.msra.gmra.mrb[16].mxu1 %vm658_vm3, %v2541_v36 }
 0x486   : > { %2363 = vmatpush3.msra.mxu1 %v1688_v52  ;;  %2364 = vmatprep.mubr.msk.f32.mxu1 %vm2808_vm0, %v2809_v1 }
 0x487   : > { %2372 = vmatprep.subr.mxu1 %v2809_v1 }
 0x489   : > { %2365 = vmatmul.mubr.msk.f32.vlgmr.msra.gmra.mrb[18].mxu1 %vm658_vm3, %v2549_v47 }
 0x48a   : > { %2373 = vmatpush3.msra.mxu1 %v1859_v53  ;;  %2374 = vmatprep.mubr.msk.f32.mxu1 %vm2808_vm0, %v2809_v1 }
 0x48d   : > { %2375 = vmatmul.mubr.msk.f32.vlgmr.msra.gmra.mrb[20].mxu1 %vm658_vm3, %v2545_v41 }
 0x4a2   : > { %v1173_v54 = vpop.xlane.xlu0 %1172 }
 0x4a6   : > { %v1002_v61 = vpop.xlane.xlu1 %1001 }
 0x4fb   : > { %v1515_v4 = vpop.xlane.xlu1 %1514 }
 0x503   : > { %v830_v55 = vpop.xlane.xlu0 %829 }
 0x504   : > { %v1857_v12 = vpop.xlane.xlu1 %1856 }
 0x507   : > { %v1344_v56 = vpop.xlane.xlu0 %1343 }
 0x50b   : > { %v1686_v57 = vpop.xlane.xlu0 %1685 }
 0x50f   : > { %v667_v58 = vpop.xlane.xlu0 %666 }
 0x510   : > { %2550 = vrcp.f32 %v667_v58 }
 0x511   : > { %2552 = vrcp.f32 %v830_v55 }
 0x512   : > { %2554 = vrcp.f32 %v1002_v61 }
 0x513   : > { %2556 = vrcp.f32 %v1173_v54 }
 0x514   : > { %2558 = vrcp.f32 %v1344_v56 }
 0x515   : > { %2560 = vrcp.f32 %v1515_v4 }
 0x516   : > { %2562 = vrcp.f32 %v1686_v57 }
 0x517   : > { %2564 = vrcp.f32 %v1857_v12 }
 0x51a   : > { %v2551_v59 = vpop.eup %2550 }
 0x51b   : > { %v742_v60 = vmul.f32 %v2551_v59, %v3220_v62  ;;  %v2553_v63 = vpop.eup %2552 }
 0x51c   : > { %v2555_v5 = vpop.eup %2554 }
 0x51d   : > { %743 = vst.msk [vmem:[#allocation4] sm:$0xff] %vm581_vm2, %v742_v60  ;;  %v2557_v62 = vpop.eup %2556 }
 0x51e   : > { %v2559_v13 = vpop.eup %2558 }
 0x51f   : > { %v2561_v22 = vpop.eup %2560 }
 0x520   : > { %v2563_v27 = vpop.eup %2562 }
 0x521   : > { %v2565_v31 = vpop.eup %2564 }
 0x548   : > { %v904_v2 = vpop.f32.mrb[8].mxu1 }
 0x549   : > { %v909_v1 = vmul.f32 %v2553_v63, %v904_v2  ;;  %v2316_v3 = vpop.f32.mrb[9].mxu1 }
 0x54b   : > { %911 = vrot.lane.b32.xlu1 %v909_v1, %s2817_s20 }
 0x54c   : > { %v1075_v6 = vpop.f32.mrb[10].mxu1 }
 0x54d   : > { %v1080_v7 = vmul.f32 %v2555_v5, %v1075_v6  ;;  %v2326_v8 = vpop.f32.mrb[11].mxu1 }
 0x54f   : > { %1082 = vrot.lane.b32.xlu0 %v1080_v7, %s2818_s8  ;;  %s3289_s8 = scalar_lea.hbm %s3345_s6, %s2209_s27 }
 0x550   : > { %v1246_v9 = vpop.f32.mrb[12].mxu1 }
 0x551   : > { %v1251_v10 = vmul.f32 %v2557_v62, %v1246_v9  ;;  %v2336_v11 = vpop.f32.mrb[13].mxu1 }
 0x553   : > { %1253 = vrot.lane.b32.xlu1 %v1251_v10, %s2819_s30  ;;  %s2029_s30 = scalar_lea.sflag [#allocation7], %s3098_s1 }
 0x554   : > { %v1417_v14 = vpop.f32.mrb[14].mxu1 }
 0x555   : > { %v1422_v15 = vmul.f32 %v2559_v13, %v1417_v14  ;;  %v2346_v16 = vpop.f32.mrb[15].mxu1 }
 0x557   : > { %1424 = vrot.lane.b32.xlu1 %v1422_v15, %s2820_s7  ;;  %s2712_s7 = sshll.u32 %s2824_s15, 4  ;;  %s2713_s7 = int_to_ptr.vmem [resolvable:$false] %s2712_s7 }
 0x558   : > { %v1588_v23 = vpop.f32.mrb[16].mxu1  ;;  %p2715_p0 = scmp.lt.s32.totalorder %s3291_s9, %s2713_s7 }
 0x559   : > { %v1593_v25 = vmul.f32 %v2561_v22, %v1588_v23  ;;  %v2356_v26 = vpop.f32.mrb[17].mxu1 }
 0x55b   : > { %1595 = vrot.lane.b32.xlu0 %v1593_v25, %s2821_s12  ;;  %s2714_s12 = scalar_lea.vmem %s2713_s7, 256 }
 0x55c   : > { %v1759_v28 = vpop.f32.mrb[18].mxu1  ;;  %p2716_p7 = scmp.lt.s32.totalorder %s2714_s12, %s2708_s24 }
 0x55d   : > { %v1764_v29 = vmul.f32 %v2563_v27, %v1759_v28  ;;  %v2366_v30 = vpop.f32.mrb[19].mxu1 }
 0x55e   : > { %p2717_p5 = por %p2716_p7, %p2715_p0 }
 0x55f   : > { %1766 = vrot.lane.b32.xlu1 %v1764_v29, %s2822_s10 }
 0x560   : > { %v1930_v32 = vpop.f32.mrb[20].mxu1  ;;  %p2718_p8 = pnand %p2717_p5, %p2711_p1 }
 0x561   : > { %v1935_v33 = vmul.f32 %v2565_v31, %v1930_v32  ;;  %v2376_v34 = vpop.f32.mrb[21].mxu1 }
 0x563   : > { %1937 = vrot.lane.b32.xlu0 %v1935_v33, %s2823_s28 }
 0x5bd   : > { %v912_v35 = vpop.permute.xlu1 %911 }
 0x5be   : > { %915 = vst.msk [vmem:[#allocation4] sm:$0xff] %vm914_vm4, %v912_v35 }
 0x5c1   : > { %v1083_v0 = vpop.permute.xlu0 %1082 }
 0x5c2   : > { %1086 = vst.msk [vmem:[#allocation4] sm:$0xff] %vm1085_vm5, %v1083_v0 }
 0x5c5   : > { %v1254_v36 = vpop.permute.xlu1 %1253 }
 0x5c6   : > { %1257 = vst.msk [vmem:[#allocation4] sm:$0xff] %vm1256_vm6, %v1254_v36 }
 0x5c9   : > { %v1425_v37 = vpop.permute.xlu1 %1424 }
 0x5ca   : > { %1428 = vst.msk [vmem:[#allocation4] sm:$0xff] %vm1427_vm7, %v1425_v37 }
 0x5cd   : > { %v1596_v38 = vpop.permute.xlu0 %1595 }
 0x5ce   : > { %1599 = vst.msk [vmem:[#allocation4] sm:$0xff] %vm1598_vm8, %v1596_v38 }
 0x5d1   : > { %v1767_v39 = vpop.permute.xlu1 %1766 }
 0x5d2   : > { %1770 = vst.msk [vmem:[#allocation4] sm:$0xff] %vm1769_vm9, %v1767_v39 }
 0x5d5   : > { %v1938_v40 = vpop.permute.xlu0 %1937 }
 0x5d6   : > { %1941 = vst.msk [vmem:[#allocation4] sm:$0xff] %vm1940_vm10, %v1938_v40 }
 0x5dd   : > { %v1942_v41 = vld [vmem:[#allocation4] sm:$0xff] }
 0x5de   : > { %2386 = vmatmul.mubr.msk.f32.vlgmr.msra.gmra.mrb[16].mxu0 %vm348_vm1, %v1942_v41 }
 0x6b1   : > { %v2023_v43 = vpop.f32.mrb[16].mxu0 }
 0x6b2   : > { %v2024_v44 = vadd.f32 %v2206_v42, %v2023_v43  ;;  %v2387_v45 = vpop.f32.mrb[17].mxu0 }
 0x6b4   : > { %2027 = vst.msk [vmem:[%s338_s13] sm:$0xff] %vm348_vm1, %v2024_v44 }
 0x6b5   : > { %2721 = shalt.err (!%p2718_p8)
}
 0x6b6   : > { %s2722_s1 = scalar_lea.hbm %s3289_s8, 128  ;;  %s2726_s29 = scalar_lea.hbm %s3345_s6, 256 }
 0x6b7   : > { %p2723_p3 = scmp.ne.s32.totalorder %s3289_s8, %s2722_s1  ;;  %p2727_p13 = scmp.lt.u32.totalorder %s3289_s8, %s3345_s6 }
 0x6b8   : > { %p2728_p12 = scmp.lt.u32.totalorder %s2726_s29, %s2722_s1  ;;  %p2730_p2 = scmp.lt.u32.totalorder %s2722_s1, %s3289_s8 }
 0x6b9   : > { %p2724_p11 = pnand %p2723_p3, %p3366_p9 }
 0x6ba   : > { %p2729_p4 = por %p2728_p12, %p2727_p13 }
 0x6bb   : > { %p2725_p6 = pneg %p2724_p11 }
 0x6bc   : > { %p2731_p10 = por %p2730_p2, %p2729_p4 }
 0x6be   : > { %p2732_p1 = pnand %p2731_p10, %p2725_p6 }
 0x6c0   : > { %2735 = shalt.err (!%p2732_p1)
}
 0x6c1   : > { %2430 = dma.vmem_to_hbm [thread:$0]  (%p3366_p9), %s3291_s9, 128, %s3289_s8, %s2029_s30  }
 0x6c2 PF: > { %s2055_s13 = sand.u32 1, %s2778_s21   ;;  %p3367_p0 = scmp.ne.s32.totalorder %s3362_s19, 0 }
 0x6c3   : > { %p3368_p7 = scmp.ge.s32.totalorder %s2798_s26, 2  ;;  %s2056_s11 = scalar_lea.sflag [#allocation7], %s2055_s13 }
 0x6c5   : > { %p2450_p5 = pnand %p3368_p7, %p3367_p0 }
 0x6c7   : > { %2773 = dma.done.wait (!%p2450_p5), %s2056_s11, 128  }
 0x6c8   : > { %2775 = vsyncadd (!%p2450_p5), %s2056_s11, 4294967168  ;;  %s24_s26 = sadd.s32 1, %s2798_s26   ;;  %s3369_s21 = smov %s2782_s22 }
 0x6c9   : > { %p21_p8 = scmp.ge.s32.totalorder %s24_s26, 4   ;;  %s3370_s22 = smov %s2786_s23 }
 0x6ca   : > { %s3371_s23 = smov %s3048_s17  ;;  %s3372_s24 = smov %s2794_s25 }
 0x6cb   : > { %s3373_s25 = smov %s3375_s18  ;;  %23 = sbr.rel (!%p21_p8) target bundleno = 10 (0xa), region = 110 }
 0x6d2   :  { %2061 = vsyncpa [#allocation6], 1 }
 0x6d3   :  { %2063 = vsyncpa [#allocation6 + $0x1], 1 }
 0x6d4   :  { %2064 = vsyncpa [#allocation9], 1 }
 0x6d5   :  { %2065 = vsyncpa [#allocation12], 1 }
 0x6d6   :  { %2066 = vsyncpa [#allocation7], 1 }
 0x6d7   :  { %2068 = vsyncpa [#allocation7 + $0x1], 1 }

</bundles_post_ra>
